<compile_context>
chip_gen: v7x
topology: tpu7x:2x2x1
jax: 0.10.0
libtpu: 0.0.40
codegen_flags: <defaults>
</compile_context>

<pallas_src>
import functools

import jax
import jax.numpy as jnp
from jax.experimental import pallas as pl
from jax.experimental.pallas import tpu as pltpu


def _round_up(x, m):
    return (x + m - 1) // m * m


def _vmem_capacity_bytes():
    """Per-core VMEM capacity; conservative fallback (v7x per-TC = 64 MiB) if unavailable."""
    try:
        info = pltpu.get_tpu_info()
        cap = getattr(info, "vmem_capacity_bytes", None)
        if cap:
            return int(cap)
    except Exception:
        pass
    return 64 * 1024 * 1024


# ---------------------------------- kernel ----------------------------------
def _rel_pos_kernel(q_ref, rel_ref, o_ref, s_ref, *, tokens, sub_tiles):
    # q_ref:   (sub_tiles, t, d)
    # rel_ref: (d, W)               pre-rotated + pre-transposed RHS
    # o_ref:   (sub_tiles, t, t)    unpadded output (masked stores if t % 128 != 0)
    # s_ref:   (sub_tiles * t, W)   f32 scratch for the matmul result
    t = tokens
    d = q_ref.shape[-1]

    # Single fused MXU matmul (free reshape: sub_tiles == 1 or t % 8 == 0, enforced by wrapper).
    q2 = q_ref[...].reshape(sub_tiles * t, d)
    s_ref[...] = jnp.dot(q2, rel_ref[...], preferred_element_type=jnp.float32)

    # Skew: the RHS columns were pre-rotated in the wrapper so that row i of each (t, W)
    # sub-tile only needs a +i lane rotation (XLU strided roll); the absolute-position result
    # then sits in columns [0, t).  Static ref-view slices keep vreg live ranges short; the
    # unroll count (sub_tiles) is capped at 8 by the wrapper.
    for sb in range(sub_tiles):
        s_sub = s_ref[sb * t:(sb + 1) * t, :]
        rolled = pltpu.roll(s_sub, shift=0, axis=1, stride=1, stride_axis=0)
        o_ref[sb] = rolled[:, :t].astype(o_ref.dtype)


# ------------------------------- host helpers --------------------------------
def _build_rel_rhs(rel_emb, tokens, width):
    """Pre-rotate + transpose rel_emb so the in-kernel skew is roll(shift=0, stride=1).

    Builds R with rows  R[c]              = rel[t-1+c]  for c in [0, t)
                        R[width-(t-1)+m]  = rel[m]      for m in [0, t-1)
                        R[c]              = 0           elsewhere (never read for j < t)
    and returns R transposed to (..., d, width). Rolling row i of (q @ R^T) right by i then
    gives exactly final[i, j] = q_i . rel[t-1+j-i] in columns j in [0, t).
    """
    t = tokens
    upper = rel_emb[..., t - 1:, :]               # rel[t-1 .. 2t-2]
    lower = rel_emb[..., :t - 1, :]               # rel[0   .. t-2]
    pad_rows = width - (2 * t - 1)
    mid_shape = rel_emb.shape[:-2] + (pad_rows, rel_emb.shape[-1])
    mid = jnp.zeros(mid_shape, rel_emb.dtype)
    rot = jnp.concatenate([upper, mid, lower], axis=-2)        # (..., width, d)
    return jnp.swapaxes(rot, -1, -2)                           # (..., d, width)


def _pick_sub_tiles(n, t, d, width, q_itemsize, out_itemsize, vmem_budget,
                    rows_cap=2048, unroll_cap=8):
    """How many (t, d) q sub-tiles to fuse into one MXU matmul per grid step."""
    if t % 8 != 0:
        return 1                                  # keep the in-kernel fused reshape free
    bb = max(1, min(n, unroll_cap, max(1, rows_cap // t)))
    while bb > 1 and n % bb != 0:
        bb -= 1

    def step_bytes(x):
        m = x * t
        return (2 * m * d * q_itemsize            # double-buffered q blocks
                + 2 * x * t * t * out_itemsize    # double-buffered out blocks
                + 2 * d * width * q_itemsize      # rel RHS (double-buffered by default)
                + m * width * 4)                  # f32 matmul-result scratch (single)

    while bb > 1 and step_bytes(bb) > vmem_budget:
        bb -= 1
        while bb > 1 and n % bb != 0:
            bb -= 1
    return bb


def _avoid_single_step(n, bb):
    """Split a single-step grid axis so both v7x TensorCores get work."""
    if bb > 1 and n // bb == 1:
        cand = bb // 2
        while cand > 1 and n % cand != 0:
            cand -= 1
        return max(1, cand)
    return bb


# ------------------------------- Pallas wrapper -------------------------------
def _rel_pos_from_rhs(q, rhs, shared_heads, compute_dtype=None):
    b, h, t, d = q.shape
    width = rhs.shape[-1]
    if shared_heads:
        assert rhs.shape == (d, width)
    else:
        assert rhs.shape == (h, d, width)

    cdt = jnp.dtype(compute_dtype) if compute_dtype is not None else jnp.dtype(q.dtype)
    out_dtype = q.dtype
    if q.dtype != cdt:
        q = q.astype(cdt)
    if rhs.dtype != cdt:                      # always match rhs dtype to the matmul input dtype
        rhs = rhs.astype(cdt)

    vmem_cap = _vmem_capacity_bytes()
    vmem_limit = int(0.75 * vmem_cap)         # 96 MiB on v5e/v6e, 48 MiB on v7x
    vmem_budget = int(0.6 * vmem_limit)       # per-step working-set target, leaves headroom
    q_isz = cdt.itemsize
    o_isz = jnp.dtype(out_dtype).itemsize

    cost = pl.CostEstimate(
        flops=2 * b * h * t * d * width,
        bytes_accessed=int(b * h * t * d * q_isz + rhs.size * q_isz + b * h * t * t * o_isz),
        transcendentals=0,
    )

    if shared_heads:
        # Fuse batch*heads into the matmul M dimension: contiguous q DMA, bigger MXU tiles.
        bh = b * h
        qf = q.reshape(bh, t, d)
        bb = _pick_sub_tiles(bh, t, d, width, q_isz, o_isz, vmem_budget)
        bb = _avoid_single_step(bh, bb)
        out = pl.pallas_call(
            functools.partial(_rel_pos_kernel, tokens=t, sub_tiles=bb),
            out_shape=jax.ShapeDtypeStruct((bh, t, t), out_dtype),
            grid_spec=pltpu.PrefetchScalarGridSpec(
                num_scalar_prefetch=0,
                grid=(bh // bb,),
                in_specs=[
                    pl.BlockSpec((bb, t, d), lambda i: (i, 0, 0)),
                    pl.BlockSpec((d, width), lambda i: (0, 0)),   # VMEM-resident across grid
                ],
                out_specs=pl.BlockSpec((bb, t, t), lambda i: (i, 0, 0)),
                scratch_shapes=[pltpu.VMEM((bb * t, width), jnp.float32)],
            ),
            compiler_params=pltpu.CompilerParams(
                dimension_semantics=("parallel",),
                vmem_limit_bytes=vmem_limit),
            cost_estimate=cost,
        )(qf, rhs)
        return out.reshape(b, h, t, t)

    # Per-head embedding: heads on the outer parallel axis so the (d, W) head block only
    # changes on the slow axis; batch sub-tiles fused into M on the inner axis.
    bb = _pick_sub_tiles(b, t, d, width, q_isz, o_isz, vmem_budget)
    if h == 1:
        bb = _avoid_single_step(b, bb)
    out = pl.pallas_call(
        functools.partial(_rel_pos_kernel, tokens=t, sub_tiles=bb),
        out_shape=jax.ShapeDtypeStruct((b, h, t, t), out_dtype),
        grid_spec=pltpu.PrefetchScalarGridSpec(
            num_scalar_prefetch=0,
            grid=(h, b // bb),
            in_specs=[
                pl.BlockSpec((bb, None, t, d), lambda hi, bi: (bi, hi, 0, 0)),
                pl.BlockSpec((None, d, width), lambda hi, bi: (hi, 0, 0)),
            ],
            out_specs=pl.BlockSpec((bb, None, t, t), lambda hi, bi: (bi, hi, 0, 0)),
            scratch_shapes=[pltpu.VMEM((bb * t, width), jnp.float32)],
        ),
        compiler_params=pltpu.CompilerParams(
            dimension_semantics=("parallel", "parallel"),
            vmem_limit_bytes=vmem_limit),
        cost_estimate=cost,
    )(q, rhs)
    return out


def rel_pos_emb_1d(q, rel_emb, shared_heads, compute_dtype=None):
    """Pallas equivalent of the PyTorch rel_pos_emb_1d (non-per-sample paths)."""
    per_sample = (rel_emb.ndim == 4 and not shared_heads) or (rel_emb.ndim == 3 and shared_heads)
    if per_sample:
        # TODO(synk): the per-sample rel_emb paths (3-D shared / 4-D per-head) of the original
        # rel_pos_emb_1d are not wired into this Pallas wrapper.
        raise NotImplementedError("per-sample rel_emb is not supported by the Pallas kernel")
    b, h, t, d = q.shape
    r2 = 2 * t - 1
    if shared_heads:
        assert rel_emb.shape == (r2, d)
    else:
        assert rel_emb.shape == (h, r2, d)
    rhs = _build_rel_rhs(rel_emb, t, _round_up(r2, 128))
    return _rel_pos_from_rhs(q, rhs, shared_heads, compute_dtype=compute_dtype)


# ---------------- pure-JAX reference (mirrors the PyTorch code) ----------------
def _relative_to_absolute_ref(qe):
    b, h, l, _ = qe.shape
    col_pad = jnp.zeros((b, h, l, 1), qe.dtype)
    x = jnp.concatenate((qe, col_pad), axis=3)
    flat_x = x.reshape(b, h, l * 2 * l)
    flat_pad = jnp.zeros((b, h, l - 1), qe.dtype)
    flat_x_padded = jnp.concatenate((flat_x, flat_pad), axis=2)
    final_x = flat_x_padded.reshape(b, h, l + 1, 2 * l - 1)
    return final_x[:, :, :l, l - 1:]


def _rel_pos_emb_1d_ref(q, rel_emb, shared_heads):
    if shared_heads:
        emb = jnp.einsum('bhtd,rd->bhtr', q, rel_emb)
    else:
        emb = jnp.einsum('bhtd,hrd->bhtr', q, rel_emb)
    return _relative_to_absolute_ref(emb)


class RelPosEmb1D:
    """JAX/Pallas port of the PyTorch RelPosEmb1D module (deterministic init).

    The rotated + transposed MXU RHS is precomputed once here so every forward call only runs
    the pallas_call (no per-call concat/transpose HBM round trip).
    """

    def __init__(self, tokens, dim_head, heads=None, key=None, compute_dtype=None):
        scale = dim_head ** (-0.5)
        self.tokens = tokens
        self.shared_heads = heads is None
        self.compute_dtype = compute_dtype
        key = jax.random.PRNGKey(42) if key is None else key
        if self.shared_heads:
            shape = (2 * tokens - 1, dim_head)
        else:
            shape = (heads, 2 * tokens - 1, dim_head)
        self.rel_pos_emb = jax.random.normal(key, shape, dtype=jnp.float32) * scale
        self._rhs = _build_rel_rhs(self.rel_pos_emb, tokens, _round_up(2 * tokens - 1, 128))

    def __call__(self, q):
        assert q.shape[2] == self.tokens
        return _rel_pos_from_rhs(q, self._rhs, self.shared_heads,
                                 compute_dtype=self.compute_dtype)


if __name__ == "__main__":
    batch, heads, tokens, dim_head = 2, 4, 8, 32
    key = jax.random.PRNGKey(0)
    kq, kp1, kp2, kq2, kp3 = jax.random.split(key, 5)

    q = jax.random.normal(kq, (batch, heads, tokens, dim_head), dtype=jnp.float32)

    # shared heads (heads=None in the PyTorch module)
    mod_shared = RelPosEmb1D(tokens, dim_head, heads=None, key=kp1)
    out_shared = jax.block_until_ready(mod_shared(q))
    ref_shared = _rel_pos_emb_1d_ref(q, mod_shared.rel_pos_emb, True)
    assert out_shared.shape == (batch, heads, tokens, tokens)
    assert jnp.allclose(out_shared, ref_shared, atol=1e-4, rtol=1e-4)

    # per-head embedding
    mod_heads = RelPosEmb1D(tokens, dim_head, heads=heads, key=kp2)
    out_heads = jax.block_until_ready(mod_heads(q))
    ref_heads = _rel_pos_emb_1d_ref(q, mod_heads.rel_pos_emb, False)
    assert out_heads.shape == (batch, heads, tokens, tokens)
    assert jnp.allclose(out_heads, ref_heads, atol=1e-4, rtol=1e-4)

    # larger tokens: validates roll shifts > 128 (crossing lane tiles), masked unpadded
    # (non-multiple-of-128) output stores, and multi-sub-tile fusion with t % 8 == 0.
    b2, h2, t2, d2 = 2, 2, 144, 32
    q2 = jax.random.normal(kq2, (b2, h2, t2, d2), dtype=jnp.float32)
    mod_big = RelPosEmb1D(t2, d2, heads=None, key=kp3)
    out_big = jax.block_until_ready(mod_big(q2))
    ref_big = _rel_pos_emb_1d_ref(q2, mod_big.rel_pos_emb, True)
    assert out_big.shape == (b2, h2, t2, t2)
    assert jnp.allclose(out_big, ref_big, atol=2e-3, rtol=2e-3)

    print("KERNEL_OK")
</pallas_src>

<mosaic_0001>
module attributes {stable_mosaic.version = 11 : i64} {
  func.func @_rel_pos_kernel(%arg0: i32, %arg1: memref<4x8x32xf32, #tpu.memory_space<vmem>>, %arg2: memref<32x128xf32, #tpu.memory_space<vmem>>, %arg3: memref<4x8x8xf32, #tpu.memory_space<vmem>>, %arg4: memref<32x128xf32, #tpu.memory_space<vmem>>) attributes {dimension_semantics = [#tpu.dimension_semantics<parallel>], iteration_bounds = array<i64: 2>, scalar_prefetch = 0 : i64, scratch_operands = 1 : i64, tpu.core_type = #tpu.core_type<tc>, window_params = [{transform_indices = @transform_0, window_bounds = array<i64: 4, 8, 32>}, {pipeline_mode = #tpu.pipeline_mode<synchronous>, transform_indices = @transform_1, window_bounds = array<i64: 32, 128>}, {transform_indices = @transform_2, window_bounds = array<i64: 4, 8, 8>}]} {
    %c0 = arith.constant 0 : index
    %c0_0 = arith.constant 0 : index
    %c0_1 = arith.constant 0 : index
    %0 = vector.load %arg1[%c0, %c0_0, %c0_1] : memref<4x8x32xf32, #tpu.memory_space<vmem>>, vector<4x8x32xf32>
    %1 = vector.shape_cast %0 : vector<4x8x32xf32> to vector<32x32xf32>
    %c0_2 = arith.constant 0 : index
    %c0_3 = arith.constant 0 : index
    %2 = vector.load %arg2[%c0_2, %c0_3] : memref<32x128xf32, #tpu.memory_space<vmem>>, vector<32x128xf32>
    %cst = arith.constant dense<0.000000e+00> : vector<32x128xf32>
    %3 = tpu.matmul %1, %2, %cst {dimension_numbers = #tpu.dot_dimension_numbers<[1], [0], [0], [1], [0, 0, 1, 1], [], []>} : vector<32x32xf32>, vector<32x128xf32>, vector<32x128xf32> -> vector<32x128xf32>
    %c0_4 = arith.constant 0 : index
    %c0_5 = arith.constant 0 : index
    %4 = vector.load %arg4[%c0_4, %c0_5] : memref<32x128xf32, #tpu.memory_space<vmem>>, vector<32x128xf32>
    tpu.vector_store %arg4[%c0_4, %c0_5], %3 {strides = array<i32>} : memref<32x128xf32, #tpu.memory_space<vmem>>, vector<32x128xf32>,
    %c0_6 = arith.constant 0 : index
    %c0_7 = arith.constant 0 : index
    %5 = vector.load %arg4[%c0_6, %c0_7] : memref<32x128xf32, #tpu.memory_space<vmem>>, vector<8x128xf32>
    %c0_i32 = arith.constant 0 : i32
    %6 = tpu.dynamic_rotate %5 by %c0_i32 dim 1 {stride = 1 : si32, stride_dimension = 0 : si32} : vector<8x128xf32>, i32 -> vector<8x128xf32>
    %7 = vector.extract_strided_slice %6 {offsets = [0, 0], sizes = [8, 8], strides = [1, 1]} : vector<8x128xf32> to vector<8x8xf32>
    %c0_8 = arith.constant 0 : index
    %c0_9 = arith.constant 0 : index
    %c0_10 = arith.constant 0 : index
    %8 = vector.load %arg3[%c0_8, %c0_9, %c0_10] : memref<4x8x8xf32, #tpu.memory_space<vmem>>, vector<1x8x8xf32>
    %9 = vector.shape_cast %8 : vector<1x8x8xf32> to vector<8x8xf32>
    %10 = vector.shape_cast %7 : vector<8x8xf32> to vector<1x8x8xf32>
    tpu.vector_store %arg3[%c0_8, %c0_9, %c0_10], %10 {strides = array<i32>} : memref<4x8x8xf32, #tpu.memory_space<vmem>>, vector<1x8x8xf32>,
    %c8 = arith.constant 8 : index
    %c0_11 = arith.constant 0 : index
    %11 = vector.load %arg4[%c8, %c0_11] : memref<32x128xf32, #tpu.memory_space<vmem>>, vector<8x128xf32>
    %c0_i32_12 = arith.constant 0 : i32
    %12 = tpu.dynamic_rotate %11 by %c0_i32_12 dim 1 {stride = 1 : si32, stride_dimension = 0 : si32} : vector<8x128xf32>, i32 -> vector<8x128xf32>
    %13 = vector.extract_strided_slice %12 {offsets = [0, 0], sizes = [8, 8], strides = [1, 1]} : vector<8x128xf32> to vector<8x8xf32>
    %c1 = arith.constant 1 : index
    %c0_13 = arith.constant 0 : index
    %c0_14 = arith.constant 0 : index
    %14 = vector.load %arg3[%c1, %c0_13, %c0_14] : memref<4x8x8xf32, #tpu.memory_space<vmem>>, vector<1x8x8xf32>
    %15 = vector.shape_cast %14 : vector<1x8x8xf32> to vector<8x8xf32>
    %16 = vector.shape_cast %13 : vector<8x8xf32> to vector<1x8x8xf32>
    tpu.vector_store %arg3[%c1, %c0_13, %c0_14], %16 {strides = array<i32>} : memref<4x8x8xf32, #tpu.memory_space<vmem>>, vector<1x8x8xf32>,
    %c16 = arith.constant 16 : index
    %c0_15 = arith.constant 0 : index
    %17 = vector.load %arg4[%c16, %c0_15] : memref<32x128xf32, #tpu.memory_space<vmem>>, vector<8x128xf32>
    %c0_i32_16 = arith.constant 0 : i32
    %18 = tpu.dynamic_rotate %17 by %c0_i32_16 dim 1 {stride = 1 : si32, stride_dimension = 0 : si32} : vector<8x128xf32>, i32 -> vector<8x128xf32>
    %19 = vector.extract_strided_slice %18 {offsets = [0, 0], sizes = [8, 8], strides = [1, 1]} : vector<8x128xf32> to vector<8x8xf32>
    %c2 = arith.constant 2 : index
    %c0_17 = arith.constant 0 : index
    %c0_18 = arith.constant 0 : index
    %20 = vector.load %arg3[%c2, %c0_17, %c0_18] : memref<4x8x8xf32, #tpu.memory_space<vmem>>, vector<1x8x8xf32>
    %21 = vector.shape_cast %20 : vector<1x8x8xf32> to vector<8x8xf32>
    %22 = vector.shape_cast %19 : vector<8x8xf32> to vector<1x8x8xf32>
    tpu.vector_store %arg3[%c2, %c0_17, %c0_18], %22 {strides = array<i32>} : memref<4x8x8xf32, #tpu.memory_space<vmem>>, vector<1x8x8xf32>,
    %c24 = arith.constant 24 : index
    %c0_19 = arith.constant 0 : index
    %23 = vector.load %arg4[%c24, %c0_19] : memref<32x128xf32, #tpu.memory_space<vmem>>, vector<8x128xf32>
    %c0_i32_20 = arith.constant 0 : i32
    %24 = tpu.dynamic_rotate %23 by %c0_i32_20 dim 1 {stride = 1 : si32, stride_dimension = 0 : si32} : vector<8x128xf32>, i32 -> vector<8x128xf32>
    %25 = vector.extract_strided_slice %24 {offsets = [0, 0], sizes = [8, 8], strides = [1, 1]} : vector<8x128xf32> to vector<8x8xf32>
    %c3 = arith.constant 3 : index
    %c0_21 = arith.constant 0 : index
    %c0_22 = arith.constant 0 : index
    %26 = vector.load %arg3[%c3, %c0_21, %c0_22] : memref<4x8x8xf32, #tpu.memory_space<vmem>>, vector<1x8x8xf32>
    %27 = vector.shape_cast %26 : vector<1x8x8xf32> to vector<8x8xf32>
    %28 = vector.shape_cast %25 : vector<8x8xf32> to vector<1x8x8xf32>
    tpu.vector_store %arg3[%c3, %c0_21, %c0_22], %28 {strides = array<i32>} : memref<4x8x8xf32, #tpu.memory_space<vmem>>, vector<1x8x8xf32>,
    return
  }
  func.func @transform_0(%arg0: i32) -> (i32, i32, i32) {
    %c0_i32 = arith.constant 0 : i32
    %c0_i32_0 = arith.constant 0 : i32
    %c0_i32_1 = arith.constant 0 : i32
    return %arg0, %c0_i32, %c0_i32_0 : i32, i32, i32
  }
  func.func @transform_1(%arg0: i32) -> (i32, i32) {
    %c0_i32 = arith.constant 0 : i32
    %c0_i32_0 = arith.constant 0 : i32
    %c0_i32_1 = arith.constant 0 : i32
    return %c0_i32, %c0_i32_0 : i32, i32
  }
  func.func @transform_2(%arg0: i32) -> (i32, i32, i32) {
    %c0_i32 = arith.constant 0 : i32
    %c0_i32_0 = arith.constant 0 : i32
    %c0_i32_1 = arith.constant 0 : i32
    return %arg0, %c0_i32, %c0_i32_0 : i32, i32, i32
  }
}

</mosaic_0001>

<bundles_post_ra>
// kernel: tpu_custom_call.1
= control target key start
LH: loop header
LB: loop body
LE: loop exit
PB: predicated region body
PF: predicated region fallthrough
CT: control target
= control target key end

     0   :  { %7 = vsyncpa [#allocation4], 0  ;;  %s899_s0 = inlined_call_operand.hbm [shape: f32[8,8,32], index: 0, kind: input, shape index: {}]   ;;  %s900_s1 = inlined_call_operand.hbm [shape: f32[32,128], index: 1, kind: input, shape index: {}]   ;;  %s901_s2 = inlined_call_operand.hbm [shape: f32[8,8,8], index: 2, kind: output, shape index: {}]  }
   0x1   :  { %9 = vsyncpa [#allocation4 + $0x1], 0 }
   0x2   :  { %10 = vsyncpa [#allocation7], 0 }
   0x3   :  { %11 = vsyncpa [#allocation5], 0 }
   0x4   :  { %13 = vsyncpa [#allocation5 + $0x1], 0  ;;  %s684_s9 = smov 0   ;;  %s686_s10 = smov 0  }
   0x5   :  { %s688_s11 = smov 0   ;;  %s690_s12 = smov 0  }
   0x6 LB: > { %s705_s13 = sadd.s32 4294967295, %s659_s12   ;;  %s410_s14 = sadd.s32 4294967294, %s659_s12   ;;  %s659_s12 = sphi %s690_s12, %s921_s12   ;;  %s655_s11 = sphi %s688_s11, %s920_s11   ;;  %s651_s10 = sphi %s686_s10, %s919_s10   ;;  %s647_s9 = sphi %s684_s9, %s918_s9  }
   0x7   : > { %p39_p0 = scmp.ne.s32.totalorder %s651_s10, %s647_s9  ;;  %p902_p1 = scmp.eq.s32.totalorder %s705_s13, 0 }
   0x8   : > { %p90_p3 = scmp.eq.s32.totalorder %s410_s14, 1  ;;  %p411_p5 = scmp.ge.s32.totalorder %s659_s12, 1 }
   0x9   : > { %p714_p4 = por %p902_p1, %p39_p0  ;;  %p97_p7 = scmp.lt.s32.totalorder %s659_s12, 3 }
   0xa   : > { %p719_p6 = por %p90_p3, %p39_p0  ;;  %s661_s18 = smov [#allocation6]  }
   0xb   : > { %s905_s15 = scalar_select %p714_p4, 1, 0 }
   0xc   : > { %s906_s16 = scalar_select %p719_p6, 1, 0 }
   0xd   : > { %p724_p8 = pnand %p411_p5, %p97_p7  ;;  %s109_s19 = sshll.u32 %s661_s18, 4  ;;  %s728_s19 = int_to_ptr.vmem [resolvable:$true] %s109_s19 }
   0xe   : > { %s740_s21 = sadd.s32 1, %s659_s12   ;;  %s26_s22 = sadd.s32 1, %s655_s11 }
   0xf   : > { %s907_s17 = scalar_select %p724_p8, 1, 0 }
  0x10   : > { %p477_p9 = pneg %p724_p8  ;;  %s23_s23 = ssub.s32 %s659_s12, %s740_s21 }
  0x11   : > { %s531_s26 = scalar_lea.hbm %s900_s1, 512 }
  0x12   : > { %p735_p11 = pnand %p477_p9, %p902_p1  ;;  %p532_p12 = scmp.ne.s32.totalorder %s900_s1, %s531_s26 }
  0x13   : > { %p538_p5 = scmp.lt.u32.totalorder %s531_s26, %s900_s1 }
  0x14   : > { %p533_p13 = pneg %p735_p11 }
  0x16   : > { %p534_p0 = pnand %p533_p13, %p532_p12 }
  0x18   : > { %p535_p3 = pneg %p534_p0 }
  0x1a   : > { %p540_p7 = pnand %p538_p5, %p535_p3 }
  0x1c   : > { %543 = shalt.err (!%p540_p7)
}
  0x1d   : > { %s544_s3 = scalar_lea.vmem %s728_s19, 512  ;;  %p552_p2 = scmp.lt.s32.totalorder %s728_s19, %s728_s19 }
  0x1e   : > { %p545_p9 = scmp.ne.s32.totalorder %s728_s19, %s544_s3  ;;  %p553_p6 = scmp.lt.s32.totalorder %s544_s3, %s544_s3 }
  0x20   : > { %p547_p10 = pnand %p545_p9, %p533_p13  ;;  %p554_p4 = por %p553_p6, %p552_p2 }
  0x22   : > { %p548_p1 = pneg %p547_p10 }
  0x24   : > { %p555_p8 = pnand %p554_p4, %p548_p1 }
  0x26   : > { %558 = shalt.err (!%p555_p8)
}
  0x27   : > { %s662_s4 = smov 128   ;;  %s663_s5 = smov 8  }
  0x28   : > { %480 = dma.hbm_to_vmem [thread:$0]  (!%p735_p11), %s900_s1, 512, %s728_s19, [#allocation7], %s662_s4, %s662_s4, %s663_s5  }
  0x29   : > { %p24_p1 = scmp.eq.s32.totalorder %s23_s23, 0  ;;  %p33_p2 = scmp.ne.s32.totalorder %s655_s11, %s651_s10 }
  0x2a   : > { %p34_p4 = scmp.eq.s32.totalorder %s659_s12, 0  ;;  %p490_p6 = scmp.lt.s32.totalorder %s659_s12, 2 }
  0x2b   : > { %s774_s8 = scalar_select %p24_p1, %s655_s11, %s26_s22  }
  0x2c   : > { %p35_p8 = por %p34_p4, %p33_p2  ;;  %p909_p10 = scmp.eq.s32.totalorder %s705_s13, 1 }
  0x2d   : > { %s123_s18 = sand.u32 1, %s655_s11   ;;  %s433_s20 = sshll.u32 %s659_s12, 9 }
  0x2e   : > { %p778_p12 = por %p909_p10, %p33_p2  ;;  %s414_s24 = sshll.u32 %s123_s18, 5 }
  0x2f   : > { %s787_s27 = scalar_lea.hbm %s899_s0, %s433_s20  ;;  %s127_s19 = scalar_lea.vmem [#allocation3], %s414_s24 }
  0x30   : > { %s134_s22 = sshll.u32 %s127_s19, 4  ;;  %p789_p11 = pnand %p490_p6, %p35_p8  ;;  %s793_s22 = int_to_ptr.vmem [resolvable:$true] %s134_s22 }
  0x31   : > { %s795_s28 = scalar_lea.sflag [#allocation4], %s123_s18  ;;  %s559_s29 = scalar_lea.hbm %s787_s27, 512 }
  0x32   : > { %p560_p13 = scmp.ne.s32.totalorder %s787_s27, %s559_s29  ;;  %p561_p0 = pneg %p789_p11 }
  0x33   : > { %s564_s6 = scalar_lea.hbm %s899_s0, 1024  ;;  %p565_p7 = scmp.lt.u32.totalorder %s787_s27, %s899_s0 }
  0x34   : > { %p562_p3 = pnand %p561_p0, %p560_p13  ;;  %p566_p9 = scmp.lt.u32.totalorder %s564_s6, %s559_s29 }
  0x35   : > { %p568_p2 = scmp.lt.u32.totalorder %s559_s29, %s787_s27 }
  0x36   : > { %p563_p5 = pneg %p562_p3  ;;  %p567_p1 = por %p566_p9, %p565_p7 }
  0x38   : > { %p569_p4 = por %p568_p2, %p567_p1 }
  0x3a   : > { %p570_p6 = pnand %p569_p4, %p563_p5 }
  0x3c   : > { %573 = shalt.err (!%p570_p6)
}
  0x3d   : > { %s574_s18 = scalar_lea.vmem %s793_s22, 512  ;;  %s664_s24 = smov [#allocation3]  }
  0x3e   : > { %p575_p8 = scmp.ne.s32.totalorder %s793_s22, %s574_s18  ;;  %s579_s25 = sshll.u32 %s664_s24, 4  ;;  %s580_s25 = int_to_ptr.vmem [resolvable:$false] %s579_s25 }
  0x3f   : > { %s581_s26 = scalar_lea.vmem %s580_s25, 1024  ;;  %p582_p3 = scmp.lt.s32.totalorder %s793_s22, %s580_s25 }
  0x40   : > { %p577_p10 = pnand %p575_p8, %p561_p0  ;;  %p583_p7 = scmp.lt.s32.totalorder %s581_s26, %s574_s18 }
  0x42   : > { %p578_p13 = pneg %p577_p10  ;;  %p584_p9 = por %p583_p7, %p582_p3 }
  0x44   : > { %p585_p1 = pnand %p584_p9, %p578_p13 }
  0x46   : > { %588 = shalt.err (!%p585_p1)
}
  0x47   : > { %484 = dma.hbm_to_vmem [thread:$0]  (!%p789_p11), %s787_s27, 512, %s793_s22, %s795_s28, %s662_s4, %s662_s4, %s663_s5  }
  0x48   : > { %p912_p0 = scmp.ne.s32.totalorder %s907_s17, 0 }
  0x49   : > { %s829_s19 = sand.u32 (!%p912_p0), 1, %s651_s10   ;;  %p913_p5 = scmp.ne.s32.totalorder (!%p912_p0), %s905_s15, 0 }
  0x4a   : > { %146 = sbr.rel (%p912_p0) target bundleno = 444 (0x1bc), region = 28  ;;  %s418_s29 = sshll.u32 (!%p912_p0), %s829_s19, 5 }
  0x4b   : > { %s149_s30 = scalar_lea.sflag (!%p912_p0), [#allocation4], %s829_s19  ;;  %s152_s23 = scalar_lea.vmem (!%p912_p0), [#allocation3], %s418_s29 }
  0x51   : > { %634 = dma.done.wait (%p913_p5), %s149_s30, 512  }
  0x52   : > { %636 = vsyncadd (%p913_p5), %s149_s30, 4294966784  ;;  %p914_p11 = scmp.eq.s32.totalorder %s705_s13, 0 }
  0x54   : > { %638 = dma.done.wait (%p914_p11), [#allocation7], 512   ;;  %p915_p2 = pmov %p914_p11 }
  0x55   : > { %vm187_vm0 = vcmask 261120   ;;  %v183_v0 = vld [vmem:[#allocation6] sm:$0xff]  ;;  %v184_v1 = vld [vmem:[#allocation6 + $0x8] sm:$0xff]  ;;  %v185_v2 = vld [vmem:[#allocation6 + $0x10] sm:$0xff]  ;;  %s665_s15 = smov 256   ;;  %vm293_vm1 = vcmask 64512  }
  0x56   : > { %640 = vsyncadd (%p915_p2), [#allocation7], 4294966784  ;;  %v457_v3 = vpack.c.bf16 %v184_v1, %v183_v0  ;;  %v186_v4 = vld [vmem:[#allocation6 + $0x18] sm:$0xff]  ;;  %v179_v5 = vld [vmem:[%s152_s23] sm:$0xff]  ;;  %s176_s17 = scalar_lea.vmem [#allocation8], %s418_s29  ;;  %s434_s5 = sshll.u32 %s705_s13, 9 }
  0x57   : > { %v181_v6 = vld [vmem:[%s152_s23 + $0x10] sm:$0xff]  ;;  %v461_v7 = vpack.c.bf16 %v186_v4, %v185_v2  ;;  %451 = vmatprep.mubr.msk.f32.mxu0 %vm187_vm0, %v179_v5  ;;  %v180_v8 = vld [vmem:[%s152_s23 + $0x8] sm:$0xff]  ;;  %v182_v9 = vld [vmem:[%s152_s23 + $0x18] sm:$0xff]  ;;  %s327_s4 = sshll.u32 %s176_s17, 4  ;;  %s855_s28 = scalar_lea.hbm %s901_s2, %s434_s5  ;;  %s850_s4 = int_to_ptr.vmem [resolvable:$true] %s327_s4 }
  0x58   : > { %454 = vmatprep.mubr.msk.f32.mxu1 %vm187_vm0, %v181_v6  ;;  %458 = vmatprep.subr.bf16.mxu0 %v457_v3  ;;  %s314_s3 = scalar_lea.sflag [#allocation5], %s829_s19  ;;  %s589_s13 = scalar_lea.vmem %s850_s4, 512 }
  0x59   : > { %465 = vmatprep.subr.bf16.mxu1 %v457_v3  ;;  %460 = vmatpush3.bf16.msra.mxu0 %v457_v3  ;;  %p590_p4 = scmp.ne.s32.totalorder %s850_s4, %s589_s13  ;;  %s666_s6 = smov [#allocation8]  }
  0x5a   : > { %467 = vmatpush3.bf16.msra.mxu1 %v457_v3  ;;  %462 = vmatprep.subr.bf16.mxu0 %v461_v7  ;;  %s593_s7 = sshll.u32 %s666_s6, 4  ;;  %s594_s7 = int_to_ptr.vmem [resolvable:$false] %s593_s7 }
  0x5b   : > { %466 = vmatprep.subr.bf16.mxu1 %v461_v7  ;;  %p591_p6 = pnand %p590_p4, %p778_p12  ;;  %s595_s20 = scalar_lea.vmem %s594_s7, 1024 }
  0x5c   : > { %p596_p10 = scmp.lt.s32.totalorder %s850_s4, %s594_s7  ;;  %p597_p13 = scmp.lt.s32.totalorder %s595_s20, %s589_s13 }
  0x5d   : > { %464 = vmatpush3.bf16.msra.mxu0 %v461_v7  ;;  %p592_p8 = pneg %p591_p6 }
  0x5e   : > { %468 = vmatpush3.bf16.msra.mxu1 %v461_v7  ;;  %p598_p3 = por %p597_p13, %p596_p10 }
  0x60   : > { %452 = vmatmul.mubr.msk.f32.vlgmr.msra.gmra.mrb[0].mxu0 %vm187_vm0, %v180_v8  ;;  %p599_p7 = pnand %p598_p3, %p592_p8 }
  0x61   : > { %455 = vmatmul.mubr.msk.f32.vlgmr.msra.gmra.mrb[0].mxu1 %vm187_vm0, %v182_v9 }
 0x133   : > { %v453_v10 = vpop.f32.mrb[0].mxu0 }
 0x134   : > { %v456_v11 = vpop.f32.mrb[0].mxu1  ;;  %v266_v12 = vpop.f32.mrb[1].mxu0 }
 0x135   : > { %v276_v13 = vpop.f32.mrb[1].mxu1  ;;  %291 = vrot.lane.b32.xlu0 %v266_v12, %s665_s15 }
 0x136   : > { %303 = vrot.lane.b32.xlu1 %v276_v13, %s665_s15 }
 0x139   : > { %297 = vrot.lane.b32.xlu0 %v453_v10, %s665_s15 }
 0x13a   : > { %309 = vrot.lane.b32.xlu1 %v456_v11, %s665_s15 }
 0x1a7   : > { %v292_v15 = vpop.permute.xlu0 %291 }
 0x1a8   : > { %v304_v14 = vpop.permute.xlu1 %303  ;;  %294 = vst.msk [vmem:[%s176_s17] sm:$0xff] %vm293_vm1, %v292_v15 }
 0x1a9   : > { %426 = vst.msk [vmem:[%s176_s17 + $0x10] sm:$0xff] %vm293_vm1, %v304_v14 }
 0x1ab   : > { %v298_v17 = vpop.permute.xlu0 %297 }
 0x1ac   : > { %v310_v16 = vpop.permute.xlu1 %309  ;;  %425 = vst.msk [vmem:[%s176_s17 + $0x8] sm:$0xff] %vm293_vm1, %v298_v17 }
 0x1ad   : > { %427 = vst.msk [vmem:[%s176_s17 + $0x18] sm:$0xff] %vm293_vm1, %v310_v16 }
 0x1ae   : > { %602 = shalt.err (!%p599_p7)
}
 0x1af   : > { %s603_s18 = scalar_lea.hbm %s855_s28, 512  ;;  %s607_s26 = scalar_lea.hbm %s901_s2, 1024 }
 0x1b0   : > { %p604_p9 = scmp.ne.s32.totalorder %s855_s28, %s603_s18  ;;  %p608_p5 = scmp.lt.u32.totalorder %s855_s28, %s901_s2 }
 0x1b1   : > { %p609_p11 = scmp.lt.u32.totalorder %s607_s26, %s603_s18  ;;  %p611_p4 = scmp.lt.u32.totalorder %s603_s18, %s855_s28 }
 0x1b2   : > { %p605_p1 = pnand %p604_p9, %p778_p12 }
 0x1b3   : > { %p610_p2 = por %p609_p11, %p608_p5 }
 0x1b4   : > { %p606_p0 = pneg %p605_p1 }
 0x1b5   : > { %p612_p6 = por %p611_p4, %p610_p2 }
 0x1b7   : > { %p613_p8 = pnand %p612_p6, %p606_p0 }
 0x1b9   : > { %616 = shalt.err (!%p613_p8)
}
 0x1ba   : > { %s667_s23 = smov 128   ;;  %s668_s15 = smov 8  }
 0x1bb   : > { %475 = dma.vmem_to_hbm [thread:$0]  (%p778_p12), %s850_s4, 512, %s855_s28, %s314_s3, %s667_s23, %s667_s23, %s668_s15  }
 0x1bc PF: > { %s342_s17 = sand.u32 1, %s647_s9   ;;  %p916_p10 = scmp.ne.s32.totalorder %s906_s16, 0 }
 0x1bd   : > { %p917_p13 = scmp.ge.s32.totalorder %s659_s12, 2  ;;  %s343_s5 = scalar_lea.sflag [#allocation5], %s342_s17 }
 0x1bf   : > { %p486_p3 = pnand %p917_p13, %p916_p10 }
 0x1c1   : > { %642 = dma.done.wait (!%p486_p3), %s343_s5, 512  }
 0x1c2   : > { %644 = vsyncadd (!%p486_p3), %s343_s5, 4294966784  ;;  %p16_p7 = scmp.ge.s32.totalorder %s740_s21, 4   ;;  %s918_s9 = smov %s651_s10 }
 0x1c3   : > { %s919_s10 = smov %s655_s11  ;;  %s920_s11 = smov %s774_s8 }
 0x1c4   : > { %s921_s12 = smov %s740_s21  ;;  %18 = sbr.rel (!%p16_p7) target bundleno = 6 (0x6), region = 80 }
 0x1cb   :  { %348 = vsyncpa [#allocation4], 1 }
 0x1cc   :  { %350 = vsyncpa [#allocation4 + $0x1], 1 }
 0x1cd   :  { %351 = vsyncpa [#allocation7], 1 }
 0x1ce   :  { %352 = vsyncpa [#allocation5], 1 }
 0x1cf   :  { %354 = vsyncpa [#allocation5 + $0x1], 1 }

</bundles_post_ra>
